<compile_context>
chip_gen: v7x
topology: tpu7x:2x2x1
jax: 0.10.0
libtpu: 0.0.40
codegen_flags: <defaults>
</compile_context>

<pallas_src>
import jax
import jax.numpy as jnp
import numpy as np
from jax.experimental import pallas as pl
from jax.experimental.pallas import tpu as pltpu

KH = KW = 4
STRIDE = 2
PAD = 1
EPS = 1e-5
NEG_SLOPE = 0.2
LANE = 128
SUBLANE = 8


def _round_up(x, m):
    return (x + m - 1) // m * m


def _conv_stats_kernel(patches_ref, w_ref, conv_ref, sum_ref, sumsq_ref):
    # patches: (TM, Kp) bf16   im2col tile
    # w:       (Kp, Cp) bf16   reshaped conv weight (constant block index -> resident)
    # conv:    (TM, Cp) f32    conv output tile
    # sum/sumsq: (1, Cp) f32   accumulators, resident across the M grid axis
    @pl.when(pl.program_id(0) == 0)
    def _():
        sum_ref[...] = jnp.zeros_like(sum_ref)
        sumsq_ref[...] = jnp.zeros_like(sumsq_ref)

    acc = jnp.dot(patches_ref[...], w_ref[...],
                  preferred_element_type=jnp.float32)          # MXU
    conv_ref[...] = acc
    sum_ref[...] += jnp.sum(acc, axis=0, keepdims=True)         # XLU reductions
    sumsq_ref[...] += jnp.sum(acc * acc, axis=0, keepdims=True)


def _bn_lrelu_kernel(conv_ref, scale_ref, shift_ref, out_ref):
    # Folded batch-norm (y = x*scale + shift) + LeakyReLU(0.2), all f32.
    y = conv_ref[...] * scale_ref[...] + shift_ref[...]
    out_ref[...] = jnp.where(y >= 0, y, NEG_SLOPE * y).astype(out_ref.dtype)


def block_forward(x_nchw, weight, gamma, beta, *, tile_m=512,
                  compute_dtype=jnp.bfloat16):
    """Forward pass of `block`.

    x_nchw: (N, C_in, H, W), weight: (C_out, C_in, 4, 4), gamma/beta: (C_out,).
    Returns (N, C_out, H//2, W//2) float32 (training-mode BatchNorm semantics).
    """
    N, C_in, H, W = x_nchw.shape
    C_out = weight.shape[0]
    H_out = (H + 2 * PAD - KH) // STRIDE + 1
    W_out = (W + 2 * PAD - KW) // STRIDE + 1
    M = N * H_out * W_out
    K = KH * KW * C_in

    Kp = _round_up(K, LANE)                 # lane-dense contraction dim
    Cp = _round_up(C_out, LANE)             # lane-dense output channels

    # Keep the bf16 input tile around <= 8 MiB so the double-buffered pipeline
    # fits comfortably inside the scoped-VMEM limit on v5e/v6e/v7x.
    max_tm_for_vmem = max(SUBLANE,
                          ((8 * 1024 * 1024) // (Kp * 2)) // SUBLANE * SUBLANE)
    TM = min(tile_m, max_tm_for_vmem, _round_up(M, SUBLANE))
    Mp = _round_up(M, TM)
    n_tiles = Mp // TM

    # --- glue: reflect pad + im2col in NHWC (bf16 for the dominant operand) ---
    x_nhwc = jnp.transpose(x_nchw, (0, 2, 3, 1)).astype(jnp.float32)
    x_pad = jnp.pad(x_nhwc, ((0, 0), (PAD, PAD), (PAD, PAD), (0, 0)),
                    mode="reflect")
    cols = []
    for kh in range(KH):
        for kw in range(KW):
            cols.append(
                x_pad[:, kh:kh + STRIDE * H_out:STRIDE,
                         kw:kw + STRIDE * W_out:STRIDE, :]
            )
    patches = jnp.stack(cols, axis=-2).reshape(M, K).astype(compute_dtype)
    # TODO(synk): build the (TM, K) patch tiles in-kernel from the padded NHWC
    # input (memory_space=pl.ANY + manual DMA) to remove the KH*KW=16x im2col
    # duplication in HBM; here the im2col output is streamed tile-by-tile
    # through the pipelined BlockSpec instead of held resident in VMEM.
    patches = jnp.pad(patches, ((0, Mp - M), (0, Kp - K)))

    # weight (C_out, C_in, KH, KW) -> (KH, KW, C_in, C_out) -> (Kp, Cp)
    # K index order = (kh*KW + kw)*C_in + ci, matching the patch stacking above.
    w_mat = jnp.transpose(weight.astype(jnp.float32), (2, 3, 1, 0)).reshape(K, C_out)
    w_mat = jnp.pad(w_mat, ((0, Kp - K), (0, Cp - C_out))).astype(compute_dtype)

    itemsize = jnp.dtype(compute_dtype).itemsize
    cost1 = pl.CostEstimate(
        flops=2 * Mp * Kp * Cp,
        transcendentals=0,
        bytes_accessed=Mp * Kp * itemsize + Kp * Cp * itemsize
                       + Mp * Cp * 4 + 2 * Cp * 4)

    # --- pass 1: conv-as-matmul + per-channel sum / sum-of-squares ---
    conv_flat, sum_c, sumsq_c = pl.pallas_call(
        _conv_stats_kernel,
        out_shape=(jax.ShapeDtypeStruct((Mp, Cp), jnp.float32),
                   jax.ShapeDtypeStruct((1, Cp), jnp.float32),
                   jax.ShapeDtypeStruct((1, Cp), jnp.float32)),
        grid=(n_tiles,),
        in_specs=[pl.BlockSpec((TM, Kp), lambda i: (i, 0)),
                  pl.BlockSpec((Kp, Cp), lambda i: (0, 0))],
        out_specs=(pl.BlockSpec((TM, Cp), lambda i: (i, 0)),
                   pl.BlockSpec((1, Cp), lambda i: (0, 0)),
                   pl.BlockSpec((1, Cp), lambda i: (0, 0))),
        compiler_params=pltpu.CompilerParams(
            dimension_semantics=("arbitrary",),     # stats accumulate across M
            vmem_limit_bytes=32 * 1024 * 1024),
        cost_estimate=cost1,
    )(patches, w_mat)

    # --- fold BN into scale/shift (tiny per-channel math, f32, plain XLA) ---
    # Zero-padded M rows contribute 0 to both sums; divide by the true M.
    mean = sum_c[0] / M
    var = jnp.maximum(sumsq_c[0] / M - mean * mean, 0.0)   # biased (training BN)
    inv_std = jax.lax.rsqrt(var + EPS)
    gamma_p = jnp.pad(gamma.astype(jnp.float32), (0, Cp - C_out))
    beta_p = jnp.pad(beta.astype(jnp.float32), (0, Cp - C_out))
    scale = (gamma_p * inv_std).reshape(1, Cp)
    shift = (beta_p - mean * gamma_p * inv_std).reshape(1, Cp)

    cost2 = pl.CostEstimate(flops=3 * Mp * Cp, transcendentals=0,
                            bytes_accessed=2 * Mp * Cp * 4 + 2 * Cp * 4)

    # --- pass 2: normalize (single FMA) + LeakyReLU, fully parallel over M ---
    out_flat = pl.pallas_call(
        _bn_lrelu_kernel,
        out_shape=jax.ShapeDtypeStruct((Mp, Cp), jnp.float32),
        grid=(n_tiles,),
        in_specs=[pl.BlockSpec((TM, Cp), lambda i: (i, 0)),
                  pl.BlockSpec((1, Cp), lambda i: (0, 0)),
                  pl.BlockSpec((1, Cp), lambda i: (0, 0))],
        out_specs=pl.BlockSpec((TM, Cp), lambda i: (i, 0)),
        compiler_params=pltpu.CompilerParams(
            dimension_semantics=("parallel",),
            vmem_limit_bytes=32 * 1024 * 1024),
        cost_estimate=cost2,
    )(conv_flat, scale, shift)

    out = out_flat[:M, :C_out].reshape(N, H_out, W_out, C_out)
    return jnp.transpose(out, (0, 3, 1, 2))               # back to NCHW


def reference_forward(x, weight, gamma, beta):
    """Pure-JAX f32 reference of the same PyTorch semantics (training-mode BN)."""
    x_pad = jnp.pad(x, ((0, 0), (0, 0), (PAD, PAD), (PAD, PAD)), mode="reflect")
    y = jax.lax.conv_general_dilated(
        x_pad, weight, window_strides=(STRIDE, STRIDE), padding="VALID",
        dimension_numbers=("NCHW", "OIHW", "NCHW"))
    mean = jnp.mean(y, axis=(0, 2, 3), keepdims=True)
    var = jnp.mean((y - mean) ** 2, axis=(0, 2, 3), keepdims=True)
    yn = (y - mean) * jax.lax.rsqrt(var + EPS)
    yn = yn * gamma.reshape(1, -1, 1, 1) + beta.reshape(1, -1, 1, 1)
    return jnp.where(yn >= 0, yn, NEG_SLOPE * yn)


if __name__ == "__main__":
    # Small shapes consistent with the module: block(in_channels=4, out_channels=8)
    N, C_IN, C_OUT, H, W = 2, 4, 8, 16, 16

    key = jax.random.PRNGKey(0)
    kx, kw_, kg, kb = jax.random.split(key, 4)
    x = jax.random.normal(kx, (N, C_IN, H, W), dtype=jnp.float32)
    weight = 0.1 * jax.random.normal(kw_, (C_OUT, C_IN, KH, KW), dtype=jnp.float32)
    gamma = 1.0 + 0.1 * jax.random.normal(kg, (C_OUT,), dtype=jnp.float32)
    beta = 0.1 * jax.random.normal(kb, (C_OUT,), dtype=jnp.float32)

    out = jax.block_until_ready(block_forward(x, weight, gamma, beta))
    ref = jax.block_until_ready(reference_forward(x, weight, gamma, beta))

    assert out.shape == (N, C_OUT, H // 2, W // 2), out.shape
    # bf16 MXU operands (f32 accumulation) -> loosen tolerance vs f32 reference.
    np.testing.assert_allclose(np.asarray(out), np.asarray(ref),
                               rtol=5e-2, atol=5e-2)

    print("KERNEL_OK")
</pallas_src>

<mosaic_0001>
module attributes {stable_mosaic.version = 11 : i64} {
  func.func @_conv_stats_kernel(%arg0: i32, %arg1: memref<128x128xbf16, #tpu.memory_space<vmem>>, %arg2: memref<128x128xbf16, #tpu.memory_space<vmem>>, %arg3: memref<128x128xf32, #tpu.memory_space<vmem>>, %arg4: memref<1x128xf32, #tpu.memory_space<vmem>>, %arg5: memref<1x128xf32, #tpu.memory_space<vmem>>) attributes {dimension_semantics = [#tpu.dimension_semantics<arbitrary>], iteration_bounds = array<i64: 1>, scalar_prefetch = 0 : i64, scratch_operands = 0 : i64, tpu.core_type = #tpu.core_type<tc>, window_params = [{transform_indices = @transform_0, window_bounds = array<i64: 128, 128>}, {pipeline_mode = #tpu.pipeline_mode<synchronous>, transform_indices = @transform_1, window_bounds = array<i64: 128, 128>}, {transform_indices = @transform_2, window_bounds = array<i64: 128, 128>}, {pipeline_mode = #tpu.pipeline_mode<synchronous>, transform_indices = @transform_3, window_bounds = array<i64: 1, 128>}, {pipeline_mode = #tpu.pipeline_mode<synchronous>, transform_indices = @transform_4, window_bounds = array<i64: 1, 128>}]} {
    %c0_i32 = arith.constant 0 : i32
    %0 = arith.cmpi eq, %arg0, %c0_i32 : i32
    %1 = arith.extui %0 : i1 to i32
    %c0_i32_0 = arith.constant 0 : i32
    %2 = arith.cmpi ne, %1, %c0_i32_0 : i32
    scf.if %2 {
      %cst_16 = arith.constant 0.000000e+00 : f32
      %18 = vector.broadcast %cst_16 : f32 to vector<1x128xf32>
      %c0_17 = arith.constant 0 : index
      %c0_18 = arith.constant 0 : index
      %19 = vector.load %arg4[%c0_17, %c0_18] : memref<1x128xf32, #tpu.memory_space<vmem>>, vector<1x128xf32>
      tpu.vector_store %arg4[%c0_17, %c0_18], %18 {strides = array<i32>} : memref<1x128xf32, #tpu.memory_space<vmem>>, vector<1x128xf32>,
      %cst_19 = arith.constant 0.000000e+00 : f32
      %20 = vector.broadcast %cst_19 : f32 to vector<1x128xf32>
      %c0_20 = arith.constant 0 : index
      %c0_21 = arith.constant 0 : index
      %21 = vector.load %arg5[%c0_20, %c0_21] : memref<1x128xf32, #tpu.memory_space<vmem>>, vector<1x128xf32>
      tpu.vector_store %arg5[%c0_20, %c0_21], %20 {strides = array<i32>} : memref<1x128xf32, #tpu.memory_space<vmem>>, vector<1x128xf32>,
    } else {
    }
    %c0 = arith.constant 0 : index
    %c0_1 = arith.constant 0 : index
    %3 = vector.load %arg1[%c0, %c0_1] : memref<128x128xbf16, #tpu.memory_space<vmem>>, vector<128x128xbf16>
    %c0_2 = arith.constant 0 : index
    %c0_3 = arith.constant 0 : index
    %4 = vector.load %arg2[%c0_2, %c0_3] : memref<128x128xbf16, #tpu.memory_space<vmem>>, vector<128x128xbf16>
    %cst = arith.constant dense<0.000000e+00> : vector<128x128xf32>
    %5 = tpu.matmul %3, %4, %cst {dimension_numbers = #tpu.dot_dimension_numbers<[1], [0], [0], [1], [0, 0, 1, 1], [], []>} : vector<128x128xbf16>, vector<128x128xbf16>, vector<128x128xf32> -> vector<128x128xf32>
    %c0_4 = arith.constant 0 : index
    %c0_5 = arith.constant 0 : index
    %6 = vector.load %arg3[%c0_4, %c0_5] : memref<128x128xf32, #tpu.memory_space<vmem>>, vector<128x128xf32>
    tpu.vector_store %arg3[%c0_4, %c0_5], %5 {strides = array<i32>} : memref<128x128xf32, #tpu.memory_space<vmem>>, vector<128x128xf32>,
    %c0_6 = arith.constant 0 : index
    %c0_7 = arith.constant 0 : index
    %7 = vector.load %arg4[%c0_6, %c0_7] : memref<1x128xf32, #tpu.memory_space<vmem>>, vector<1x128xf32>
    %cst_8 = arith.constant dense<0.000000e+00> : vector<128xf32>
    %8 = vector.multi_reduction <add>, %5, %cst_8 [0] : vector<128x128xf32> to vector<128xf32>
    %9 = vector.shape_cast %8 : vector<128xf32> to vector<1x128xf32>
    %10 = arith.addf %7, %9 : vector<1x128xf32>
    %c0_9 = arith.constant 0 : index
    %c0_10 = arith.constant 0 : index
    %11 = vector.load %arg4[%c0_9, %c0_10] : memref<1x128xf32, #tpu.memory_space<vmem>>, vector<1x128xf32>
    tpu.vector_store %arg4[%c0_9, %c0_10], %10 {strides = array<i32>} : memref<1x128xf32, #tpu.memory_space<vmem>>, vector<1x128xf32>,
    %c0_11 = arith.constant 0 : index
    %c0_12 = arith.constant 0 : index
    %12 = vector.load %arg5[%c0_11, %c0_12] : memref<1x128xf32, #tpu.memory_space<vmem>>, vector<1x128xf32>
    %13 = arith.mulf %5, %5 : vector<128x128xf32>
    %cst_13 = arith.constant dense<0.000000e+00> : vector<128xf32>
    %14 = vector.multi_reduction <add>, %13, %cst_13 [0] : vector<128x128xf32> to vector<128xf32>
    %15 = vector.shape_cast %14 : vector<128xf32> to vector<1x128xf32>
    %16 = arith.addf %12, %15 : vector<1x128xf32>
    %c0_14 = arith.constant 0 : index
    %c0_15 = arith.constant 0 : index
    %17 = vector.load %arg5[%c0_14, %c0_15] : memref<1x128xf32, #tpu.memory_space<vmem>>, vector<1x128xf32>
    tpu.vector_store %arg5[%c0_14, %c0_15], %16 {strides = array<i32>} : memref<1x128xf32, #tpu.memory_space<vmem>>, vector<1x128xf32>,
    return
  }
  func.func @transform_0(%arg0: i32) -> (i32, i32) {
    %c0_i32 = arith.constant 0 : i32
    %c0_i32_0 = arith.constant 0 : i32
    return %arg0, %c0_i32 : i32, i32
  }
  func.func @transform_1(%arg0: i32) -> (i32, i32) {
    %c0_i32 = arith.constant 0 : i32
    %c0_i32_0 = arith.constant 0 : i32
    %c0_i32_1 = arith.constant 0 : i32
    return %c0_i32, %c0_i32_0 : i32, i32
  }
  func.func @transform_2(%arg0: i32) -> (i32, i32) {
    %c0_i32 = arith.constant 0 : i32
    %c0_i32_0 = arith.constant 0 : i32
    return %arg0, %c0_i32 : i32, i32
  }
  func.func @transform_3(%arg0: i32) -> (i32, i32) {
    %c0_i32 = arith.constant 0 : i32
    %c0_i32_0 = arith.constant 0 : i32
    %c0_i32_1 = arith.constant 0 : i32
    return %c0_i32, %c0_i32_0 : i32, i32
  }
  func.func @transform_4(%arg0: i32) -> (i32, i32) {
    %c0_i32 = arith.constant 0 : i32
    %c0_i32_0 = arith.constant 0 : i32
    %c0_i32_1 = arith.constant 0 : i32
    return %c0_i32, %c0_i32_0 : i32, i32
  }
}

</mosaic_0001>

<bundles_post_ra>
// kernel: tpu_custom_call.1
= control target key start
LH: loop header
LB: loop body
LE: loop exit
PB: predicated region body
PF: predicated region fallthrough
CT: control target
= control target key end

     0   :  { %10 = vsyncpa [#allocation3], 0  ;;  %s753_s0 = inlined_call_operand.hbm [shape: bf16[128,128], index: 0, kind: input, shape index: {}]   ;;  %s754_s1 = inlined_call_operand.hbm [shape: bf16[128,128], index: 1, kind: input, shape index: {}]   ;;  %s755_s2 = inlined_call_operand.hbm [shape: f32[128,128], index: 2, kind: output, shape index: {0}]   ;;  %s756_s3 = inlined_call_operand.hbm [shape: f32[1,128], index: 3, kind: output, shape index: {1}]   ;;  %s757_s4 = inlined_call_operand.hbm [shape: f32[1,128], index: 4, kind: output, shape index: {2}]  }
   0x1   :  { %11 = vsyncpa [#allocation6], 0 }
   0x2   :  { %12 = vsyncpa [#allocation4], 0 }
   0x3   :  { %13 = vsyncpa [#allocation9], 0  ;;  %s625_s15 = smov [#allocation2]   ;;  %s507_s19 = scalar_lea.hbm %s753_s0, 1024 }
   0x4   :  { %s19_s16 = sshll.u32 %s625_s15, 4  ;;  %p508_p0 = scmp.ne.s32.totalorder %s753_s0, %s507_s19  ;;  %s20_s16 = int_to_ptr.vmem [resolvable:$true] %s19_s16 }
   0x5   :  { %p511_p1 = scmp.lt.u32.totalorder %s507_s19, %s753_s0 }
   0x7   :  { %p513_p2 = pnand %p511_p1, %p508_p0 }
   0x9   :  { %516 = shalt.err (!%p513_p2)
}
   0xa   :  { %s517_s24 = scalar_lea.vmem %s20_s16, 1024  ;;  %p522_p4 = scmp.lt.s32.totalorder %s20_s16, %s20_s16 }
   0xb   :  { %p518_p3 = scmp.ne.s32.totalorder %s20_s16, %s517_s24  ;;  %p523_p5 = scmp.lt.s32.totalorder %s517_s24, %s517_s24 }
   0xd   :  { %p524_p6 = por %p523_p5, %p522_p4 }
   0xf   :  { %p525_p7 = pnand %p524_p6, %p518_p3 }
  0x11   :  { %528 = shalt.err (!%p525_p7)
}
  0x12   :  { %s626_s25 = smov 64   ;;  %s627_s26 = smov 4  }
  0x13   :  { %25 = dma.hbm_to_vmem [thread:$0]  %s753_s0, 1024, %s20_s16, [#allocation3], %s626_s25, %s626_s25, %s627_s26  }
  0x14   :  { %s628_s29 = smov [#allocation5]   ;;  %s529_s7 = scalar_lea.hbm %s754_s1, 1024 }
  0x15   :  { %s31_s30 = sshll.u32 %s628_s29, 4  ;;  %p530_p8 = scmp.ne.s32.totalorder %s754_s1, %s529_s7  ;;  %s32_s30 = int_to_ptr.vmem [resolvable:$true] %s31_s30 }
  0x16   :  { %p533_p9 = scmp.lt.u32.totalorder %s529_s7, %s754_s1 }
  0x18   :  { %p535_p10 = pnand %p533_p9, %p530_p8 }
  0x1a   :  { %538 = shalt.err (!%p535_p10)
}
  0x1b   :  { %s539_s12 = scalar_lea.vmem %s32_s30, 1024  ;;  %p544_p12 = scmp.lt.s32.totalorder %s32_s30, %s32_s30 }
  0x1c   :  { %p540_p11 = scmp.ne.s32.totalorder %s32_s30, %s539_s12  ;;  %p545_p13 = scmp.lt.s32.totalorder %s539_s12, %s539_s12 }
  0x1e   :  { %p546_p0 = por %p545_p13, %p544_p12 }
  0x20   :  { %p547_p1 = pnand %p546_p0, %p540_p11 }
  0x22   :  { %550 = shalt.err (!%p547_p1)
}
  0x23   :  { %37 = dma.hbm_to_vmem [thread:$0]  %s754_s1, 1024, %s32_s30, [#allocation6], %s626_s25, %s626_s25, %s627_s26  }
  0x24   :  { %617 = dma.done.wait [#allocation3], 1024  }
  0x25   :  { %618 = vsyncadd [#allocation3], 4294966272 }
  0x26   :  { %619 = dma.done.wait [#allocation6], 1024  }
  0x27   :  { %620 = vsyncadd [#allocation6], 4294966272  ;;  %v491_v0 = vld [vmem:[#allocation5] sm:$0xff]   ;;  %v492_v1 = vld [vmem:[#allocation5 + $0x8] sm:$0xff]   ;;  %v629_v16 = vmov 0.0   ;;  %s630_s1 = smov [#allocation7]  }
  0x28   :  { %433 = vmatprep.subr.bf16.mxu0 %v491_v0  ;;  %465 = vmatprep.subr.bf16.mxu1 %v491_v0  ;;  %v493_v2 = vld [vmem:[#allocation5 + $0x10] sm:$0xff]   ;;  %v494_v3 = vld [vmem:[#allocation5 + $0x18] sm:$0xff]   ;;  %v499_v4 = vld [vmem:[#allocation2] sm:$0xff]   ;;  %49 = vst [vmem:[#allocation8] sm:$0x1] %v629_v16  ;;  %s361_s14 = sshll.u32 %s630_s1, 4  ;;  %s693_s14 = int_to_ptr.vmem [resolvable:$true] %s361_s14 }
  0x29   :  { %434 = vmatpush3.bf16.msra.mxu0 %v491_v0  ;;  %473 = vmatpush3.bf16.msra.mxu1 %v491_v0  ;;  %v495_v5 = vld [vmem:[#allocation5 + $0x20] sm:$0xff]   ;;  %v496_v7 = vld [vmem:[#allocation5 + $0x28] sm:$0xff]   ;;  %v497_v8 = vld [vmem:[#allocation5 + $0x30] sm:$0xff]   ;;  %50 = vst [vmem:[#allocation10] sm:$0x1] %v629_v16  ;;  %s551_s15 = scalar_lea.vmem %s693_s14, 2048  ;;  %p556_p3 = scmp.lt.s32.totalorder %s693_s14, %s693_s14 }
  0x2a   :  { %435 = vmatprep.subr.bf16.mxu0 %v492_v1  ;;  %466 = vmatprep.subr.bf16.mxu1 %v492_v1  ;;  %v503_v6 = vld [vmem:[#allocation2 + $0x20] sm:$0xff]   ;;  %v498_v9 = vld [vmem:[#allocation5 + $0x38] sm:$0xff]   ;;  %v500_v10 = vld [vmem:[#allocation2 + $0x8] sm:$0xff]   ;;  %p552_p2 = scmp.ne.s32.totalorder %s693_s14, %s551_s15  ;;  %p557_p4 = scmp.lt.s32.totalorder %s551_s15, %s551_s15 }
  0x2b   :  { %449 = vmatprep.mubr.bf16.mxu0 %v499_v4  ;;  %457 = vmatprep.mubr.bf16.mxu1 %v503_v6  ;;  %v504_v11 = vld [vmem:[#allocation2 + $0x28] sm:$0xff]   ;;  %v501_v12 = vld [vmem:[#allocation2 + $0x10] sm:$0xff]   ;;  %v502_v14 = vld [vmem:[#allocation2 + $0x18] sm:$0xff]  }
  0x2c   :  { %v505_v13 = vld [vmem:[#allocation2 + $0x30] sm:$0xff]   ;;  %v506_v15 = vld [vmem:[#allocation2 + $0x38] sm:$0xff]   ;;  %p558_p5 = por %p557_p4, %p556_p3 }
  0x2d   :  { %436 = vmatpush3.bf16.msra.mxu0 %v492_v1  ;;  %474 = vmatpush3.bf16.msra.mxu1 %v492_v1 }
  0x2e   :  { %437 = vmatprep.subr.bf16.mxu0 %v493_v2  ;;  %467 = vmatprep.subr.bf16.mxu1 %v493_v2  ;;  %p559_p6 = pnand %p558_p5, %p552_p2 }
  0x31   :  { %438 = vmatpush3.bf16.msra.mxu0 %v493_v2  ;;  %475 = vmatpush3.bf16.msra.mxu1 %v493_v2 }
  0x32   :  { %439 = vmatprep.subr.bf16.mxu0 %v494_v3  ;;  %468 = vmatprep.subr.bf16.mxu1 %v494_v3 }
  0x35   :  { %440 = vmatpush3.bf16.msra.mxu0 %v494_v3  ;;  %476 = vmatpush3.bf16.msra.mxu1 %v494_v3 }
  0x36   :  { %441 = vmatprep.subr.bf16.mxu0 %v495_v5  ;;  %469 = vmatprep.subr.bf16.mxu1 %v495_v5 }
  0x39   :  { %442 = vmatpush3.bf16.msra.mxu0 %v495_v5  ;;  %477 = vmatpush3.bf16.msra.mxu1 %v495_v5 }
  0x3a   :  { %443 = vmatprep.subr.bf16.mxu0 %v496_v7  ;;  %470 = vmatprep.subr.bf16.mxu1 %v496_v7 }
  0x3d   :  { %444 = vmatpush3.bf16.msra.mxu0 %v496_v7  ;;  %478 = vmatpush3.bf16.msra.mxu1 %v496_v7 }
  0x3e   :  { %445 = vmatprep.subr.bf16.mxu0 %v497_v8  ;;  %471 = vmatprep.subr.bf16.mxu1 %v497_v8 }
  0x41   :  { %446 = vmatpush3.bf16.msra.mxu0 %v497_v8  ;;  %479 = vmatpush3.bf16.msra.mxu1 %v497_v8 }
  0x42   :  { %447 = vmatprep.subr.bf16.mxu0 %v498_v9  ;;  %472 = vmatprep.subr.bf16.mxu1 %v498_v9 }
  0x45   :  { %448 = vmatpush3.bf16.msra.mxu0 %v498_v9  ;;  %480 = vmatpush3.bf16.msra.mxu1 %v498_v9 }
  0x48   :  { %450 = vmatmul.mubr.bf16.vlgmr.msra.gmra.mrb[0].mxu0 %v500_v10  ;;  %458 = vmatmul.mubr.bf16.vlgmr.msra.gmra.mrb[0].mxu1 %v504_v11 }
  0x49   :  { %453 = vmatprep.mubr.bf16.mxu0 %v501_v12  ;;  %461 = vmatprep.mubr.bf16.mxu1 %v505_v13 }
  0x50   :  { %454 = vmatmul.mubr.bf16.gmra.mrb[4].mxu0 %v502_v14  ;;  %462 = vmatmul.mubr.bf16.gmra.mrb[4].mxu1 %v506_v15 }
 0x11b   :  { %v451_v17 = vpop.f32.mrb[0].mxu0  ;;  %v684_v18 = vpop.f32.mrb[0].mxu1 }
 0x11c   :  { %278 = vst [vmem:[#allocation7 + $0x10] sm:$0xff] %v451_v17  ;;  %v213_v19 = vpop.f32.mrb[1].mxu0  ;;  %286 = vst [vmem:[#allocation7 + $0x50] sm:$0xff] %v684_v18  ;;  %v687_v20 = vpop.f32.mrb[1].mxu1  ;;  %v319_v28 = vmul.f32 %v451_v17, %v451_v17 }
 0x11d   :  { %276 = vst [vmem:[#allocation7] sm:$0xff] %v213_v19  ;;  %v452_v21 = vpop.f32.mrb[2].mxu0  ;;  %284 = vst [vmem:[#allocation7 + $0x40] sm:$0xff] %v687_v20  ;;  %v690_v22 = vpop.f32.mrb[2].mxu1  ;;  %v317_v25 = vmul.f32 %v213_v19, %v213_v19 }
 0x11e   :  { %279 = vst [vmem:[#allocation7 + $0x18] sm:$0xff] %v452_v21  ;;  %v216_v23 = vpop.f32.mrb[3].mxu0  ;;  %287 = vst [vmem:[#allocation7 + $0x58] sm:$0xff] %v690_v22  ;;  %v248_v24 = vpop.f32.mrb[3].mxu1  ;;  %v320_v31 = vmul.f32 %v452_v21, %v452_v21 }
 0x11f   :  { %277 = vst [vmem:[#allocation7 + $0x8] sm:$0xff] %v216_v23  ;;  %v293_v26 = vadd.f32 %v216_v23, %v213_v19  ;;  %v318_v27 = vmul.f32 %v216_v23, %v216_v23  ;;  %285 = vst [vmem:[#allocation7 + $0x48] sm:$0xff] %v248_v24 }
 0x121   :  { %v294_v29 = vadd.f32 %v451_v17, %v293_v26  ;;  %v333_v30 = vadd.f32 %v318_v27, %v317_v25 }
 0x123   :  { %v334_v32 = vadd.f32 %v333_v30, %v319_v28  ;;  %v455_v33 = vpop.f32.mrb[4].mxu0  ;;  %v295_v34 = vadd.f32 %v452_v21, %v294_v29  ;;  %v463_v35 = vpop.f32.mrb[4].mxu1 }
 0x124   :  { %282 = vst [vmem:[#allocation7 + $0x30] sm:$0xff] %v455_v33  ;;  %v229_v36 = vpop.f32.mrb[5].mxu0  ;;  %290 = vst [vmem:[#allocation7 + $0x70] sm:$0xff] %v463_v35  ;;  %v261_v37 = vpop.f32.mrb[5].mxu1 }
 0x125   :  { %280 = vst [vmem:[#allocation7 + $0x20] sm:$0xff] %v229_v36  ;;  %v296_v38 = vadd.f32 %v295_v34, %v229_v36  ;;  %v321_v39 = vmul.f32 %v229_v36, %v229_v36  ;;  %v335_v40 = vadd.f32 %v334_v32, %v320_v31  ;;  %v456_v41 = vpop.f32.mrb[6].mxu0  ;;  %288 = vst [vmem:[#allocation7 + $0x60] sm:$0xff] %v261_v37  ;;  %v464_v42 = vpop.f32.mrb[6].mxu1 }
 0x126   :  { %283 = vst [vmem:[#allocation7 + $0x38] sm:$0xff] %v456_v41  ;;  %v232_v43 = vpop.f32.mrb[7].mxu0  ;;  %291 = vst [vmem:[#allocation7 + $0x78] sm:$0xff] %v464_v42  ;;  %v264_v44 = vpop.f32.mrb[7].mxu1 }
 0x127   :  { %v336_v45 = vadd.f32 %v335_v40, %v321_v39  ;;  %281 = vst [vmem:[#allocation7 + $0x28] sm:$0xff] %v232_v43  ;;  %v297_v46 = vadd.f32 %v296_v38, %v232_v43  ;;  %v322_v47 = vmul.f32 %v232_v43, %v232_v43  ;;  %289 = vst [vmem:[#allocation7 + $0x68] sm:$0xff] %v264_v44 }
 0x128   :  { %562 = shalt.err (!%p559_p6)
}
 0x129   :  { %s563_s18 = scalar_lea.hbm %s755_s2, 2048 }
 0x12a   :  { %p564_p7 = scmp.ne.s32.totalorder %s755_s2, %s563_s18  ;;  %p567_p8 = scmp.lt.u32.totalorder %s563_s18, %s755_s2 }
 0x12c   :  { %p569_p9 = pnand %p567_p8, %p564_p7 }
 0x12e   :  { %572 = shalt.err (!%p569_p9)
}
 0x12f   :  { %s631_s23 = smov 128   ;;  %s632_s24 = smov 8   ;;  %v323_v48 = vmul.f32 %v455_v33, %v455_v33  ;;  %v298_v49 = vadd.f32 %v455_v33, %v297_v46  ;;  %v337_v50 = vadd.f32 %v336_v45, %v322_v47  ;;  %v324_v51 = vmul.f32 %v456_v41, %v456_v41  ;;  %v316_v27 = vld [vmem:[#allocation10] sm:$0x1] }
 0x130   :  { %367 = dma.vmem_to_hbm [thread:$0]  %s693_s14, 2048, %s755_s2, [#allocation4], %s631_s23, %s631_s23, %s632_s24   ;;  %v325_v54 = vmul.f32 %v687_v20, %v687_v20  ;;  %v326_v59 = vmul.f32 %v248_v24, %v248_v24  ;;  %v327_v60 = vmul.f32 %v684_v18, %v684_v18  ;;  %v328_v63 = vmul.f32 %v690_v22, %v690_v22 }
 0x131   :  { %v338_v52 = vadd.f32 %v337_v50, %v323_v48  ;;  %v299_v53 = vadd.f32 %v456_v41, %v298_v49  ;;  %v329_v2 = vmul.f32 %v261_v37, %v261_v37  ;;  %v330_v7 = vmul.f32 %v264_v44, %v264_v44  ;;  %s633_s2 = smov [#allocation8]   ;;  %s634_s28 = smov [#allocation10]  }
 0x132   :  { %v331_v8 = vmul.f32 %v463_v35, %v463_v35  ;;  %v332_v11 = vmul.f32 %v464_v42, %v464_v42  ;;  %s374_s27 = sshll.u32 %s633_s2, 4  ;;  %s384_s29 = sshll.u32 %s634_s28, 4  ;;  %s375_s27 = int_to_ptr.vmem [resolvable:$true] %s374_s27  ;;  %s721_s29 = int_to_ptr.vmem [resolvable:$true] %s384_s29 }
 0x133   :  { %v300_v55 = vadd.f32 %v299_v53, %v687_v20  ;;  %v339_v56 = vadd.f32 %v338_v52, %v324_v51  ;;  %s573_s30 = scalar_lea.vmem %s375_s27, 16  ;;  %s577_s5 = scalar_lea.vmem %s375_s27, 32 }
 0x134   :  { %p574_p10 = scmp.ne.s32.totalorder %s375_s27, %s573_s30  ;;  %p578_p11 = scmp.lt.s32.totalorder %s375_s27, %s375_s27 }
 0x135   :  { %v340_v57 = vadd.f32 %v339_v56, %v325_v54  ;;  %v301_v58 = vadd.f32 %v300_v55, %v248_v24  ;;  %v292_v24 = vld [vmem:[#allocation8] sm:$0x1]  ;;  %p579_p12 = scmp.lt.s32.totalorder %s577_s5, %s573_s30 }
 0x137   :  { %v302_v61 = vadd.f32 %v684_v18, %v301_v58  ;;  %v341_v62 = vadd.f32 %v340_v57, %v326_v59  ;;  %p580_p13 = por %p579_p12, %p578_p11 }
 0x139   :  { %v342_v0 = vadd.f32 %v341_v62, %v327_v60  ;;  %v303_v1 = vadd.f32 %v690_v22, %v302_v61  ;;  %p581_p0 = pnand %p580_p13, %p574_p10 }
 0x13b   :  { %v304_v3 = vadd.f32 %v303_v1, %v261_v37  ;;  %v343_v4 = vadd.f32 %v342_v0, %v328_v63 }
 0x13d   :  { %v344_v5 = vadd.f32 %v343_v4, %v329_v2  ;;  %v305_v6 = vadd.f32 %v304_v3, %v264_v44 }
 0x13f   :  { %v306_v9 = vadd.f32 %v463_v35, %v305_v6  ;;  %v345_v10 = vadd.f32 %v344_v5, %v330_v7 }
 0x141   :  { %v307_v12 = vadd.f32 %v464_v42, %v306_v9  ;;  %v346_v13 = vadd.f32 %v345_v10, %v331_v8 }
 0x143   :  { %v308_v14 = vrot.slane %v307_v12, 4  ;;  %v347_v15 = vadd.f32 %v346_v13, %v332_v11 }
 0x145   :  { %v309_v16 = vadd.f32 %v308_v14, %v307_v12  ;;  %v348_v17 = vrot.slane %v347_v15, 4 }
 0x147   :  { %v310_v18 = vrot.slane %v309_v16, 2  ;;  %v349_v19 = vadd.f32 %v348_v17, %v347_v15 }
 0x149   :  { %v311_v20 = vadd.f32 %v310_v18, %v309_v16  ;;  %v350_v21 = vrot.slane %v349_v19, 2 }
 0x14b   :  { %v351_v22 = vadd.f32 %v350_v21, %v349_v19  ;;  %v312_v23 = vrot.slane %v311_v20, 1 }
 0x14d   :  { %v313_v25 = vadd.f32 %v312_v23, %v311_v20  ;;  %v352_v26 = vrot.slane %v351_v22, 1 }
 0x14f   :  { %v314_v28 = vadd.f32 %v313_v25, %v292_v24  ;;  %v353_v29 = vadd.f32 %v352_v26, %v351_v22 }
 0x151   :  { %315 = vst [vmem:[#allocation8] sm:$0x1] %v314_v28  ;;  %v354_v30 = vadd.f32 %v353_v29, %v316_v27 }
 0x152   :  { %584 = shalt.err (!%p581_p0)
}
 0x153   :  { %s585_s8 = scalar_lea.hbm %s756_s3, 16 }
 0x154   :  { %p586_p1 = scmp.ne.s32.totalorder %s756_s3, %s585_s8  ;;  %p589_p2 = scmp.lt.u32.totalorder %s585_s8, %s756_s3 }
 0x156   :  { %p591_p3 = pnand %p589_p2, %p586_p1 }
 0x158   :  { %594 = shalt.err (!%p591_p3)
}
 0x159   :  { %377 = dma.vmem_to_hbm [thread:$0]  %s375_s27, 16, %s756_s3, [#allocation9]   ;;  %355 = vst [vmem:[#allocation10] sm:$0x1] %v354_v30 }
 0x15a   :  { %s595_s1 = scalar_lea.vmem %s721_s29, 16  ;;  %s599_s14 = scalar_lea.vmem %s721_s29, 32 }
 0x15b   :  { %p596_p4 = scmp.ne.s32.totalorder %s721_s29, %s595_s1  ;;  %p600_p5 = scmp.lt.s32.totalorder %s721_s29, %s721_s29 }
 0x15c   :  { %p601_p6 = scmp.lt.s32.totalorder %s599_s14, %s595_s1 }
 0x15e   :  { %p602_p7 = por %p601_p6, %p600_p5 }
 0x160   :  { %p603_p8 = pnand %p602_p7, %p596_p4 }
 0x162   :  { %606 = shalt.err (!%p603_p8)
}
 0x163   :  { %s607_s17 = scalar_lea.hbm %s757_s4, 16 }
 0x164   :  { %p608_p9 = scmp.ne.s32.totalorder %s757_s4, %s607_s17  ;;  %p611_p10 = scmp.lt.u32.totalorder %s607_s17, %s757_s4 }
 0x166   :  { %p613_p11 = pnand %p611_p10, %p608_p9 }
 0x168   :  { %616 = shalt.err (!%p613_p11)
}
 0x169   :  { %387 = dma.vmem_to_hbm [thread:$0]  %s721_s29, 16, %s757_s4, [#allocation9]  }
 0x16a   :  { %621 = dma.done.wait [#allocation4], 2048  }
 0x16b   :  { %622 = vsyncadd [#allocation4], 4294965248 }
 0x16c   :  { %623 = dma.done.wait [#allocation9], 32  }
 0x16d   :  { %624 = vsyncadd [#allocation9], 4294967264 }
 0x16e   :  { %397 = vsyncpa [#allocation3], 1 }
 0x16f   :  { %398 = vsyncpa [#allocation6], 1 }
 0x170   :  { %399 = vsyncpa [#allocation4], 1 }
 0x171   :  { %400 = vsyncpa [#allocation9], 1 }

</bundles_post_ra>
